<compile_context>
chip_gen: v7x
topology: tpu7x:2x2x1
jax: 0.10.0
libtpu: 0.0.40
codegen_flags: <defaults>
</compile_context>

<pallas_src>
import functools

import jax
import jax.numpy as jnp
from jax.experimental import pallas as pl
from jax.experimental.pallas import tpu as pltpu


def _convt_tanh_kernel(x_ref, w_ref, b_ref, o_ref):
    # x_ref: (bb, Cin, HW)   lane dim = HW  (lane-dense loads, no wasted lanes)
    # w_ref: (Nf, Cin)       tiny, constant index across grid steps
    # b_ref: (Nf, 1)         broadcast over lanes
    # o_ref: (bb, Nf, HW)    lane dim = HW  (lane-dense, unmasked stores)
    w = w_ref[...]
    b = b_ref[...]
    # Static unroll over the (small) batch block keeps every dot a plain 2-D
    # MXU matmul -- no batched-dot / relayout complications.
    for bi in range(x_ref.shape[0]):
        acc = jnp.dot(w, x_ref[bi], preferred_element_type=jnp.float32)
        o_ref[bi] = jnp.tanh(acc + b).astype(o_ref.dtype)


@functools.partial(jax.jit, static_argnames=("nchw_output",))
def conv_transpose2d_tanh(x, weight, bias, *, nchw_output=True):
    """ConvTranspose2d(kernel_size=2, stride=2, padding=0) + Tanh.

    Args:
      x:      (N, Cin, H, W)      float32, NCHW (PyTorch convention)
      weight: (Cin, Cout, 2, 2)   float32 (PyTorch ConvTranspose2d layout)
      bias:   (Cout,)             float32
      nchw_output: if True return (N, Cout, 2H, 2W) NCHW (module semantics);
        if False return the kernel-native (N, Cout, 2, 2, H, W) layout so a
        downstream consumer can fuse the 2x2 interleave itself.
    """
    N, Cin, H, W = x.shape
    assert weight.shape[0] == Cin and weight.shape[2:] == (2, 2), weight.shape
    Cout = weight.shape[1]
    Kh, Kw = 2, 2
    HW = H * W
    Nf = Cout * Kh * Kw

    # Free reshape: NCHW is already contiguous as (N, Cin, H*W) -- no transpose.
    x2 = x.reshape(N, Cin, HW)
    # Tiny parameter reshuffles (Nf*Cin and Nf elements), done once by XLA.
    w2 = jnp.transpose(weight.reshape(Cin, Nf))       # (Nf, Cin), f = co*4 + kh*2 + kw
    b2 = jnp.repeat(bias, Kh * Kw).reshape(Nf, 1)     # (Nf, 1)

    # Collapse the grid: whole batch in one step when it easily fits VMEM
    # (stay far under v7x's 32 MiB scoped / 64 MiB physical), else one image
    # per grid step. bb is either N or 1, so it always divides N exactly.
    bytes_per_img = 4 * HW * (Cin + 2 * Nf)           # x tile + double-buffered out
    bb = N if (N <= 8 and N * bytes_per_img <= (4 << 20)) else 1
    grid = (N // bb,)
    # "parallel" only pays off when there is more than one step to shard.
    dim_sem = ("arbitrary",) if grid[0] == 1 else ("parallel",)

    y = pl.pallas_call(
        _convt_tanh_kernel,
        out_shape=jax.ShapeDtypeStruct((N, Nf, HW), x.dtype),
        grid_spec=pltpu.PrefetchScalarGridSpec(
            num_scalar_prefetch=0,
            grid=grid,
            in_specs=[
                pl.BlockSpec((bb, Cin, HW), lambda i: (i, 0, 0)),
                # Weight / bias are tiny and constant-index; default buffering
                # costs nothing measurable at this size (grid is 1 step anyway).
                pl.BlockSpec((Nf, Cin), lambda i: (0, 0)),
                pl.BlockSpec((Nf, 1), lambda i: (0, 0)),
            ],
            out_specs=pl.BlockSpec((bb, Nf, HW), lambda i: (i, 0, 0)),
        ),
        compiler_params=pltpu.CompilerParams(dimension_semantics=dim_sem),
    )(x2, w2, b2)

    y = y.reshape(N, Cout, Kh, Kw, H, W)              # free (splits contiguous dims)
    if not nchw_output:
        return y
    # Single output-side transpose back to NCHW (module contract).
    # TODO(synk): do this interleave inside the kernel store instead.
    y = jnp.transpose(y, (0, 1, 4, 2, 5, 3))          # (N, Cout, H, 2, W, 2)
    return y.reshape(N, Cout, H * Kh, W * Kw)


def _reference(x, weight, bias):
    """Independent pure-JAX reference with PyTorch ConvTranspose2d semantics.

    A transposed conv (k=2, s=2, p=0) equals a regular conv over the
    stride-dilated input with the spatially-flipped, channel-transposed kernel
    and padding = k - 1 - p = 1.
    """
    w = jnp.transpose(weight[:, :, ::-1, ::-1], (1, 0, 2, 3))   # (Cout, Cin, 2, 2)
    y = jax.lax.conv_general_dilated(
        x, w,
        window_strides=(1, 1),
        padding=((1, 1), (1, 1)),
        lhs_dilation=(2, 2),
        dimension_numbers=("NCHW", "OIHW", "NCHW"),
        precision=jax.lax.Precision.HIGHEST)
    return jnp.tanh(y + bias.reshape(1, -1, 1, 1))


if __name__ == "__main__":
    key = jax.random.PRNGKey(0)
    k_x, k_w, k_b = jax.random.split(key, 3)

    N, Cin, H, W = 2, 4, 16, 16
    Cout = 8

    x = jax.random.normal(k_x, (N, Cin, H, W), dtype=jnp.float32)

    # Deterministic init mimicking PyTorch's default uniform(-bound, bound),
    # bound = 1/sqrt(Cin * Kh * Kw).
    bound = 1.0 / jnp.sqrt(jnp.float32(Cin * 2 * 2))
    weight = jax.random.uniform(k_w, (Cin, Cout, 2, 2),
                                minval=-bound, maxval=bound, dtype=jnp.float32)
    bias = jax.random.uniform(k_b, (Cout,),
                              minval=-bound, maxval=bound, dtype=jnp.float32)

    out = jax.block_until_ready(conv_transpose2d_tanh(x, weight, bias))
    ref = jax.block_until_ready(_reference(x, weight, bias))

    assert out.shape == (N, Cout, 2 * H, 2 * W), out.shape
    max_err = float(jnp.max(jnp.abs(out - ref)))
    assert jnp.allclose(out, ref, atol=2e-5, rtol=2e-5), max_err

    print("KERNEL_OK")
</pallas_src>

<mosaic_0001>
module attributes {stable_mosaic.version = 11 : i64} {
  func.func @_convt_tanh_kernel(%arg0: i32, %arg1: memref<2x4x256xf32, #tpu.memory_space<vmem>>, %arg2: memref<32x4xf32, #tpu.memory_space<vmem>>, %arg3: memref<32x1xf32, #tpu.memory_space<vmem>>, %arg4: memref<2x32x256xf32, #tpu.memory_space<vmem>>) attributes {dimension_semantics = [#tpu.dimension_semantics<arbitrary>], iteration_bounds = array<i64: 1>, scalar_prefetch = 0 : i64, scratch_operands = 0 : i64, tpu.core_type = #tpu.core_type<tc>, window_params = [{transform_indices = @transform_0, window_bounds = array<i64: 2, 4, 256>}, {pipeline_mode = #tpu.pipeline_mode<synchronous>, transform_indices = @transform_1, window_bounds = array<i64: 32, 4>}, {pipeline_mode = #tpu.pipeline_mode<synchronous>, transform_indices = @transform_2, window_bounds = array<i64: 32, 1>}, {transform_indices = @transform_3, window_bounds = array<i64: 2, 32, 256>}]} {
    %c0 = arith.constant 0 : index
    %c0_0 = arith.constant 0 : index
    %0 = vector.load %arg2[%c0, %c0_0] : memref<32x4xf32, #tpu.memory_space<vmem>>, vector<32x4xf32>
    %c0_1 = arith.constant 0 : index
    %c0_2 = arith.constant 0 : index
    %1 = vector.load %arg3[%c0_1, %c0_2] : memref<32x1xf32, #tpu.memory_space<vmem>>, vector<32x1xf32>
    %c0_3 = arith.constant 0 : index
    %c0_4 = arith.constant 0 : index
    %c0_5 = arith.constant 0 : index
    %2 = vector.load %arg1[%c0_3, %c0_4, %c0_5] : memref<2x4x256xf32, #tpu.memory_space<vmem>>, vector<1x4x256xf32>
    %3 = vector.shape_cast %2 : vector<1x4x256xf32> to vector<4x256xf32>
    %cst = arith.constant dense<0.000000e+00> : vector<32x256xf32>
    %4 = tpu.matmul %0, %3, %cst {dimension_numbers = #tpu.dot_dimension_numbers<[1], [0], [0], [1], [0, 0, 1, 1], [], []>} : vector<32x4xf32>, vector<4x256xf32>, vector<32x256xf32> -> vector<32x256xf32>
    %5 = vector.broadcast %1 : vector<32x1xf32> to vector<32x256xf32>
    %6 = arith.addf %4, %5 : vector<32x256xf32>
    %7 = math.tanh %6 : vector<32x256xf32>
    %c0_6 = arith.constant 0 : index
    %c0_7 = arith.constant 0 : index
    %c0_8 = arith.constant 0 : index
    %8 = vector.load %arg4[%c0_6, %c0_7, %c0_8] : memref<2x32x256xf32, #tpu.memory_space<vmem>>, vector<1x32x256xf32>
    %9 = vector.shape_cast %8 : vector<1x32x256xf32> to vector<32x256xf32>
    %10 = vector.shape_cast %7 : vector<32x256xf32> to vector<1x32x256xf32>
    tpu.vector_store %arg4[%c0_6, %c0_7, %c0_8], %10 {strides = array<i32>} : memref<2x32x256xf32, #tpu.memory_space<vmem>>, vector<1x32x256xf32>,
    %c1 = arith.constant 1 : index
    %c0_9 = arith.constant 0 : index
    %c0_10 = arith.constant 0 : index
    %11 = vector.load %arg1[%c1, %c0_9, %c0_10] : memref<2x4x256xf32, #tpu.memory_space<vmem>>, vector<1x4x256xf32>
    %12 = vector.shape_cast %11 : vector<1x4x256xf32> to vector<4x256xf32>
    %cst_11 = arith.constant dense<0.000000e+00> : vector<32x256xf32>
    %13 = tpu.matmul %0, %12, %cst_11 {dimension_numbers = #tpu.dot_dimension_numbers<[1], [0], [0], [1], [0, 0, 1, 1], [], []>} : vector<32x4xf32>, vector<4x256xf32>, vector<32x256xf32> -> vector<32x256xf32>
    %14 = vector.broadcast %1 : vector<32x1xf32> to vector<32x256xf32>
    %15 = arith.addf %13, %14 : vector<32x256xf32>
    %16 = math.tanh %15 : vector<32x256xf32>
    %c1_12 = arith.constant 1 : index
    %c0_13 = arith.constant 0 : index
    %c0_14 = arith.constant 0 : index
    %17 = vector.load %arg4[%c1_12, %c0_13, %c0_14] : memref<2x32x256xf32, #tpu.memory_space<vmem>>, vector<1x32x256xf32>
    %18 = vector.shape_cast %17 : vector<1x32x256xf32> to vector<32x256xf32>
    %19 = vector.shape_cast %16 : vector<32x256xf32> to vector<1x32x256xf32>
    tpu.vector_store %arg4[%c1_12, %c0_13, %c0_14], %19 {strides = array<i32>} : memref<2x32x256xf32, #tpu.memory_space<vmem>>, vector<1x32x256xf32>,
    return
  }
  func.func @transform_0(%arg0: i32) -> (i32, i32, i32) {
    %c0_i32 = arith.constant 0 : i32
    %c0_i32_0 = arith.constant 0 : i32
    %c0_i32_1 = arith.constant 0 : i32
    return %arg0, %c0_i32, %c0_i32_0 : i32, i32, i32
  }
  func.func @transform_1(%arg0: i32) -> (i32, i32) {
    %c0_i32 = arith.constant 0 : i32
    %c0_i32_0 = arith.constant 0 : i32
    %c0_i32_1 = arith.constant 0 : i32
    return %c0_i32, %c0_i32_0 : i32, i32
  }
  func.func @transform_2(%arg0: i32) -> (i32, i32) {
    %c0_i32 = arith.constant 0 : i32
    %c0_i32_0 = arith.constant 0 : i32
    %c0_i32_1 = arith.constant 0 : i32
    return %c0_i32, %c0_i32_0 : i32, i32
  }
  func.func @transform_3(%arg0: i32) -> (i32, i32, i32) {
    %c0_i32 = arith.constant 0 : i32
    %c0_i32_0 = arith.constant 0 : i32
    %c0_i32_1 = arith.constant 0 : i32
    return %arg0, %c0_i32, %c0_i32_0 : i32, i32, i32
  }
}

</mosaic_0001>

<bundles_post_ra>
// kernel: conv_transpose2d_tanh.1
= control target key start
LH: loop header
LB: loop body
LE: loop exit
PB: predicated region body
PF: predicated region fallthrough
CT: control target
= control target key end

     0   :  { %vm58_vm0 = vcmask 1043456   ;;  %v345_v2 = vmov 0.0   ;;  %v346_v5 = vmov 0   ;;  %vm45_vm1 = vcmask 31744   ;;  %s457_s0 = inlined_call_operand.vmem [shape: f32[2,4,256], index: 0, kind: input, shape index: {}]   ;;  %s458_s1 = inlined_call_operand.vmem [shape: f32[32,4], index: 1, kind: input, shape index: {}]   ;;  %s459_s2 = inlined_call_operand.vmem [shape: f32[32,1], index: 2, kind: input, shape index: {}]   ;;  %s460_s3 = inlined_call_operand.vmem [shape: f32[2,32,256], index: 3, kind: output, shape index: {}]  }
   0x1   :  { %v22_v0 = vld [vmem:[%s457_s0] sm:$0xff]  ;;  %v292_v1 = vld [vmem:[%s457_s0 + $0x8] sm:$0xff]  ;;  %127 = vmatprep.mubr.f32.mxu0 %v345_v2  ;;  %240 = vmatprep.mubr.f32.mxu1 %v345_v2  ;;  %v20_v8 = vld [vmem:[%s459_s2 + $0x10] sm:$0xff] }
   0x2   :  { %v44_v3 = vcombine.high %v22_v0, %v22_v0  ;;  %v171_v4 = vcombine.high %v292_v1, %v292_v1  ;;  %309 = vset.pattern.permute.xlu0 %v346_v5  ;;  %310 = vset.pattern.permute.xlu1 %v346_v5  ;;  %v14_v6 = vld [vmem:[%s458_s1] sm:$0xff]  ;;  %v15_v9 = vld [vmem:[%s458_s1 + $0x8] sm:$0xff]  ;;  %v21_v11 = vld [vmem:[%s459_s2 + $0x18] sm:$0xff] }
   0x3   :  { %v18_v7 = vld [vmem:[%s459_s2] sm:$0xff]  ;;  %35 = vperm.xlu1 %310, %v20_v8   ;;  %v19_v10 = vld [vmem:[%s459_s2 + $0x8] sm:$0xff]  ;;  %v16_v12 = vld [vmem:[%s458_s1 + $0x10] sm:$0xff] }
   0x4   :  { %286 = vmatprep.subr.msk.mxu0 %vm58_vm0, %v44_v3  ;;  %293 = vmatprep.subr.msk.mxu1 %vm58_vm0, %v171_v4  ;;  %v17_v13 = vld [vmem:[%s458_s1 + $0x18] sm:$0xff] }
   0x5   :  { %287 = vmatpush1.msk.msra.mxu0 %vm58_vm0, %v22_v0  ;;  %294 = vmatpush1.msk.msra.mxu1 %vm58_vm0, %v292_v1 }
   0x6   :  { %288 = vmatmul.mubr.msk.f32.vlgmr.msra.gmra.mrb[0].mxu0 %vm45_vm1, %v14_v6  ;;  %295 = vmatmul.mubr.msk.f32.vlgmr.msra.gmra.mrb[0].mxu1 %vm45_vm1, %v14_v6 }
   0x7   :  { %133 = vmatprep.mubr.f32.mxu0 %v345_v2  ;;  %246 = vmatprep.mubr.f32.mxu1 %v345_v2 }
   0x8   :  { %25 = vperm.xlu0 %309, %v18_v7   ;;  %40 = vperm.xlu1 %310, %v21_v11  }
   0xa   :  { %289 = vmatmul.mubr.msk.f32.gmra.mrb[2].mxu0 %vm45_vm1, %v15_v9  ;;  %296 = vmatmul.mubr.msk.f32.gmra.mrb[2].mxu1 %vm45_vm1, %v15_v9 }
   0xb   :  { %139 = vmatprep.mubr.f32.mxu0 %v345_v2  ;;  %252 = vmatprep.mubr.f32.mxu1 %v345_v2 }
   0xc   :  { %30 = vperm.xlu0 %309, %v19_v10  }
   0xe   :  { %290 = vmatmul.mubr.msk.f32.gmra.mrb[4].mxu0 %vm45_vm1, %v16_v12  ;;  %297 = vmatmul.mubr.msk.f32.gmra.mrb[4].mxu1 %vm45_vm1, %v16_v12 }
   0xf   :  { %145 = vmatprep.mubr.f32.mxu0 %v345_v2  ;;  %258 = vmatprep.mubr.f32.mxu1 %v345_v2 }
  0x12   :  { %291 = vmatmul.mubr.msk.f32.gmra.mrb[6].mxu0 %vm45_vm1, %v17_v13  ;;  %298 = vmatmul.mubr.msk.f32.gmra.mrb[6].mxu1 %vm45_vm1, %v17_v13 }
  0x82   :  { %v36_v24 = vpop.permute.xlu1 %35 }
  0x87   :  { %v26_v14 = vpop.permute.xlu0 %25  ;;  %v41_v41 = vpop.permute.xlu1 %40 }
  0x8b   :  { %v31_v23 = vpop.permute.xlu0 %30 }
  0xd9   :  { %v129_v15 = vpop.f32.mrb[0].mxu0  ;;  %v242_v16 = vpop.f32.mrb[0].mxu1 }
  0xda   :  { %v130_v17 = vadd.f32 %v129_v15, %v26_v14  ;;  %v243_v18 = vadd.f32 %v242_v16, %v26_v14  ;;  %v131_v19 = vpop.f32.mrb[1].mxu0  ;;  %v244_v20 = vpop.f32.mrb[1].mxu1 }
  0xdb   :  { %v132_v21 = vadd.f32 %v131_v19, %v26_v14  ;;  %v245_v22 = vadd.f32 %v244_v20, %v26_v14 }
  0xdc   :  { %313 = vtanh.f32 %v130_v17 }
  0xdd   :  { %315 = vtanh.f32 %v243_v18  ;;  %v135_v25 = vpop.f32.mrb[2].mxu0  ;;  %v248_v26 = vpop.f32.mrb[2].mxu1 }
  0xde   :  { %317 = vtanh.f32 %v132_v21  ;;  %v136_v27 = vadd.f32 %v135_v25, %v31_v23  ;;  %v249_v28 = vadd.f32 %v248_v26, %v31_v23  ;;  %v137_v29 = vpop.f32.mrb[3].mxu0  ;;  %v250_v30 = vpop.f32.mrb[3].mxu1 }
  0xdf   :  { %319 = vtanh.f32 %v245_v22  ;;  %v138_v31 = vadd.f32 %v137_v29, %v31_v23  ;;  %v251_v32 = vadd.f32 %v250_v30, %v31_v23 }
  0xe0   :  { %321 = vtanh.f32 %v136_v27 }
  0xe1   :  { %323 = vtanh.f32 %v249_v28  ;;  %v141_v33 = vpop.f32.mrb[4].mxu0  ;;  %v254_v34 = vpop.f32.mrb[4].mxu1 }
  0xe2   :  { %325 = vtanh.f32 %v138_v31  ;;  %v142_v35 = vadd.f32 %v141_v33, %v36_v24  ;;  %v255_v36 = vadd.f32 %v254_v34, %v36_v24  ;;  %v143_v37 = vpop.f32.mrb[5].mxu0  ;;  %v256_v38 = vpop.f32.mrb[5].mxu1 }
  0xe3   :  { %327 = vtanh.f32 %v251_v32  ;;  %v144_v39 = vadd.f32 %v143_v37, %v36_v24  ;;  %v257_v40 = vadd.f32 %v256_v38, %v36_v24 }
  0xe4   :  { %329 = vtanh.f32 %v142_v35 }
  0xe5   :  { %331 = vtanh.f32 %v255_v36  ;;  %v147_v42 = vpop.f32.mrb[6].mxu0  ;;  %v260_v43 = vpop.f32.mrb[6].mxu1 }
  0xe6   :  { %v314_v44 = vpop.eup %313  ;;  %333 = vtanh.f32 %v144_v39  ;;  %v148_v45 = vadd.f32 %v147_v42, %v41_v41  ;;  %v261_v46 = vadd.f32 %v260_v43, %v41_v41  ;;  %v149_v47 = vpop.f32.mrb[7].mxu0 }
  0xe7   :  { %v262_v48 = vpop.f32.mrb[7].mxu1  ;;  %v316_v49 = vpop.eup %315  ;;  %160 = vst [vmem:[%s460_s3] sm:$0xff] %v314_v44  ;;  %335 = vtanh.f32 %v257_v40  ;;  %v150_v50 = vadd.f32 %v149_v47, %v41_v41 }
  0xe8   :  { %v263_v51 = vadd.f32 %v262_v48, %v41_v41  ;;  %v318_v52 = vpop.eup %317  ;;  %299 = vst [vmem:[%s460_s3 + $0x40] sm:$0xff] %v316_v49  ;;  %337 = vtanh.f32 %v148_v45 }
  0xe9   :  { %v320_v53 = vpop.eup %319  ;;  %161 = vst [vmem:[%s460_s3 + $0x8] sm:$0xff] %v318_v52  ;;  %339 = vtanh.f32 %v261_v46 }
  0xea   :  { %v322_v54 = vpop.eup %321  ;;  %300 = vst [vmem:[%s460_s3 + $0x48] sm:$0xff] %v320_v53  ;;  %341 = vtanh.f32 %v150_v50 }
  0xeb   :  { %v324_v55 = vpop.eup %323  ;;  %162 = vst [vmem:[%s460_s3 + $0x10] sm:$0xff] %v322_v54  ;;  %343 = vtanh.f32 %v263_v51 }
  0xec   :  { %v326_v56 = vpop.eup %325  ;;  %301 = vst [vmem:[%s460_s3 + $0x50] sm:$0xff] %v324_v55 }
  0xed   :  { %v328_v57 = vpop.eup %327  ;;  %163 = vst [vmem:[%s460_s3 + $0x18] sm:$0xff] %v326_v56 }
  0xee   :  { %v330_v58 = vpop.eup %329  ;;  %302 = vst [vmem:[%s460_s3 + $0x58] sm:$0xff] %v328_v57 }
  0xef   :  { %v332_v59 = vpop.eup %331  ;;  %164 = vst [vmem:[%s460_s3 + $0x20] sm:$0xff] %v330_v58 }
  0xf0   :  { %v334_v60 = vpop.eup %333  ;;  %303 = vst [vmem:[%s460_s3 + $0x60] sm:$0xff] %v332_v59 }
  0xf1   :  { %v336_v61 = vpop.eup %335  ;;  %165 = vst [vmem:[%s460_s3 + $0x28] sm:$0xff] %v334_v60 }
  0xf2   :  { %v338_v62 = vpop.eup %337  ;;  %304 = vst [vmem:[%s460_s3 + $0x68] sm:$0xff] %v336_v61 }
  0xf3   :  { %v340_v63 = vpop.eup %339  ;;  %166 = vst [vmem:[%s460_s3 + $0x30] sm:$0xff] %v338_v62 }
  0xf4   :  { %v342_v0 = vpop.eup %341  ;;  %305 = vst [vmem:[%s460_s3 + $0x70] sm:$0xff] %v340_v63 }
  0xf5   :  { %v344_v1 = vpop.eup %343  ;;  %167 = vst [vmem:[%s460_s3 + $0x38] sm:$0xff] %v342_v0 }
  0xf6   :  { %306 = vst [vmem:[%s460_s3 + $0x78] sm:$0xff] %v344_v1 }

</bundles_post_ra>
